<compile_context>
chip_gen: v6e
topology: v6e:2x2x1
jax: 0.10.0
libtpu: 0.0.40
codegen_flags: <defaults>
</compile_context>

<pallas_src>
import functools

import jax
import jax.numpy as jnp
from jax.experimental import pallas as pl
from jax.experimental.pallas import tpu as pltpu

LN_EPS = 1e-5           # nn.LayerNorm default
_LANE = 128             # TPU lane width
_K_TILE_THRESHOLD = 2048
_K_TILE = 512


def _round_up(x, m):
    return ((x + m - 1) // m) * m


def _k_tiling(K):
    """Pick the K (reduction) tile and the padded K extent."""
    if K <= _K_TILE_THRESHOLD:
        return K, K                       # weight block holds the full K: one k step
    return _K_TILE, _round_up(K, _K_TILE)  # stream the weight in (tk, N_pad) blocks


def _vmem_limit_bytes(tm, tk, n_pad, x_itemsize, w_itemsize, out_itemsize):
    # double-buffered inputs + double-buffered output + f32 accumulator scratch
    need = 2 * (tm * tk * x_itemsize + tk * n_pad * w_itemsize + 3 * n_pad * w_itemsize)
    need += 2 * tm * n_pad * out_itemsize
    need += tm * n_pad * 4
    return int(min(max(2 * need + (4 << 20), 32 << 20), 112 << 20))


def block_kernel(x_ref, w_ref, b_ref, gamma_ref, beta_ref, o_ref, acc_ref, *, n_true):
    # x_ref:     (tm, tk)       tile of input rows
    # w_ref:     (tk, N_pad)    weight block (already [K, N] layout)
    # b_ref:     (1,  N_pad)    linear bias        (zero-padded past n_true)
    # gamma_ref: (1,  N_pad)    LayerNorm scale    (zero-padded past n_true)
    # beta_ref:  (1,  N_pad)    LayerNorm shift    (zero-padded past n_true)
    # o_ref:     (tm, N_pad)    output tile
    # acc_ref:   (tm, N_pad)    f32 accumulator scratch (resident across k)
    k = pl.program_id(1)

    @pl.when(k == 0)
    def _():
        acc_ref[...] = jnp.zeros_like(acc_ref)

    # Native-dtype operands on the MXU, f32 accumulation.
    acc_ref[...] += jnp.dot(x_ref[...], w_ref[...],
                            preferred_element_type=jnp.float32)

    @pl.when(k == pl.num_programs(1) - 1)
    def _():
        y = acc_ref[...] + b_ref[...].astype(jnp.float32)
        n_pad = y.shape[-1]
        inv_n = 1.0 / float(n_true)

        # Mean over the true feature count. Padded columns contribute exactly 0
        # (zero weight columns, zero bias), so the plain sum is already correct.
        mean = jnp.sum(y, axis=-1, keepdims=True) * inv_n
        diff = y - mean
        if n_pad != n_true:
            col = jax.lax.broadcasted_iota(jnp.int32, (1, n_pad), 1)
            diff = jnp.where(col < n_true, diff, 0.0)
        var = jnp.sum(diff * diff, axis=-1, keepdims=True) * inv_n
        y_hat = diff * jax.lax.rsqrt(var + LN_EPS)
        out = (y_hat * gamma_ref[...].astype(jnp.float32)
               + beta_ref[...].astype(jnp.float32))
        o_ref[...] = out.astype(o_ref.dtype)


def prepare_params(weight, bias, gamma, beta):
    """One-time parameter preparation (outside the hot path).

    weight: [output_size, input_size] (PyTorch nn.Linear layout).
    Returns weight as [K_pad, N_pad] plus zero-padded (1, N_pad) row vectors.
    """
    n_out, K = weight.shape
    _, K_pad = _k_tiling(K)
    n_pad = _round_up(n_out, _LANE)

    w_kn = jnp.pad(weight.T, ((0, K_pad - K), (0, n_pad - n_out)))
    b2 = jnp.pad(bias, (0, n_pad - n_out)).reshape(1, n_pad)
    g2 = jnp.pad(gamma, (0, n_pad - n_out)).reshape(1, n_pad)
    be2 = jnp.pad(beta, (0, n_pad - n_out)).reshape(1, n_pad)
    return w_kn, b2, g2, be2


@functools.partial(jax.jit, static_argnames=("n_out", "tm"))
def block_forward(x, w_kn, b2, g2, be2, *, n_out, tm=256):
    """x: [batch, seq, input_size]; w_kn: [K_pad, N_pad] from prepare_params."""
    B, S, K = x.shape
    K_pad, N_pad = w_kn.shape
    tk, k_pad_expected = _k_tiling(K)
    assert K_pad == k_pad_expected, "weight was prepared for a different input_size"

    M = B * S
    # Big row tiles for MXU utilization, clamped so tiny inputs don't explode.
    tm_eff = min(tm, _round_up(M, _LANE))
    M_pad = _round_up(M, tm_eff)

    x2 = x.reshape(M, K)
    if M_pad != M or K_pad != K:
        x2 = jnp.pad(x2, ((0, M_pad - M), (0, K_pad - K)))

    grid = (M_pad // tm_eff, K_pad // tk)
    vmem_limit = _vmem_limit_bytes(tm_eff, tk, N_pad,
                                   x2.dtype.itemsize, w_kn.dtype.itemsize,
                                   x.dtype.itemsize)

    out = pl.pallas_call(
        functools.partial(block_kernel, n_true=n_out),
        out_shape=jax.ShapeDtypeStruct((M_pad, N_pad), x.dtype),
        grid_spec=pltpu.PrefetchScalarGridSpec(
            num_scalar_prefetch=0,
            grid=grid,
            in_specs=[
                pl.BlockSpec((tm_eff, tk), lambda i, k: (i, k)),   # x rows tile
                pl.BlockSpec((tk, N_pad), lambda i, k: (k, 0)),    # weight block
                pl.BlockSpec((1, N_pad), lambda i, k: (0, 0)),     # bias
                pl.BlockSpec((1, N_pad), lambda i, k: (0, 0)),     # gamma
                pl.BlockSpec((1, N_pad), lambda i, k: (0, 0)),     # beta
            ],
            out_specs=pl.BlockSpec((tm_eff, N_pad), lambda i, k: (i, 0)),
            scratch_shapes=[pltpu.VMEM((tm_eff, N_pad), jnp.float32)],
        ),
        compiler_params=pltpu.CompilerParams(
            dimension_semantics=("parallel", "arbitrary"),
            vmem_limit_bytes=vmem_limit,
        ),
    )(x2, w_kn, b2, g2, be2)

    return out[:M, :n_out].reshape(B, S, n_out)


def block_reference(x, weight, bias, gamma, beta):
    y = jnp.einsum("bsk,nk->bsn", x, weight) + bias
    mean = jnp.mean(y, axis=-1, keepdims=True)
    var = jnp.mean(jnp.square(y - mean), axis=-1, keepdims=True)
    return (y - mean) * jax.lax.rsqrt(var + LN_EPS) * gamma + beta


if __name__ == "__main__":
    # Small shapes consistent with Block(input_size, output_size)
    batch, seq = 2, 8
    input_size, output_size = 32, 64

    key = jax.random.PRNGKey(0)
    k_x, k_w, k_b = jax.random.split(key, 3)

    x = jax.random.normal(k_x, (batch, seq, input_size), dtype=jnp.float32)

    # Deterministic parameter init (synthetic, not a checkpoint load)
    bound = 1.0 / (input_size ** 0.5)
    weight = jax.random.uniform(k_w, (output_size, input_size),
                                minval=-bound, maxval=bound, dtype=jnp.float32)
    bias = jax.random.uniform(k_b, (output_size,),
                              minval=-bound, maxval=bound, dtype=jnp.float32)
    gamma = jnp.ones((output_size,), dtype=jnp.float32)   # LayerNorm default init
    beta = jnp.zeros((output_size,), dtype=jnp.float32)

    # One-time parameter prep (transpose + lane padding) outside the hot path.
    w_kn, b2, g2, be2 = prepare_params(weight, bias, gamma, beta)

    out = block_forward(x, w_kn, b2, g2, be2, n_out=output_size)
    jax.block_until_ready(out)

    ref = block_reference(x, weight, bias, gamma, beta)
    assert out.shape == (batch, seq, output_size)
    assert jnp.allclose(out, ref, atol=1e-4, rtol=1e-4), "mismatch vs reference"

    print("KERNEL_OK")
</pallas_src>

<mosaic_0001>
module attributes {stable_mosaic.version = 11 : i64} {
  func.func @block_kernel(%arg0: i32, %arg1: i32, %arg2: memref<128x32xf32, #tpu.memory_space<vmem>>, %arg3: memref<32x128xf32, #tpu.memory_space<vmem>>, %arg4: memref<1x128xf32, #tpu.memory_space<vmem>>, %arg5: memref<1x128xf32, #tpu.memory_space<vmem>>, %arg6: memref<1x128xf32, #tpu.memory_space<vmem>>, %arg7: memref<128x128xf32, #tpu.memory_space<vmem>>, %arg8: memref<128x128xf32, #tpu.memory_space<vmem>>) attributes {dimension_semantics = [#tpu.dimension_semantics<parallel>, #tpu.dimension_semantics<arbitrary>], iteration_bounds = array<i64: 1, 1>, scalar_prefetch = 0 : i64, scratch_operands = 1 : i64, tpu.core_type = #tpu.core_type<tc>, window_params = [{transform_indices = @transform_0, window_bounds = array<i64: 128, 32>}, {transform_indices = @transform_1, window_bounds = array<i64: 32, 128>}, {pipeline_mode = #tpu.pipeline_mode<synchronous>, transform_indices = @transform_2, window_bounds = array<i64: 1, 128>}, {pipeline_mode = #tpu.pipeline_mode<synchronous>, transform_indices = @transform_3, window_bounds = array<i64: 1, 128>}, {pipeline_mode = #tpu.pipeline_mode<synchronous>, transform_indices = @transform_4, window_bounds = array<i64: 1, 128>}, {transform_indices = @transform_5, window_bounds = array<i64: 128, 128>}]} {
    %c0_i32 = arith.constant 0 : i32
    %0 = arith.cmpi eq, %arg1, %c0_i32 : i32
    %1 = arith.extui %0 : i1 to i32
    %c0_i32_0 = arith.constant 0 : i32
    %2 = arith.cmpi ne, %1, %c0_i32_0 : i32
    scf.if %2 {
      %cst_10 = arith.constant 0.000000e+00 : f32
      %12 = vector.broadcast %cst_10 : f32 to vector<128x128xf32>
      %c0_11 = arith.constant 0 : index
      %c0_12 = arith.constant 0 : index
      %13 = vector.load %arg8[%c0_11, %c0_12] : memref<128x128xf32, #tpu.memory_space<vmem>>, vector<128x128xf32>
      tpu.vector_store %arg8[%c0_11, %c0_12], %12 {strides = array<i32>} : memref<128x128xf32, #tpu.memory_space<vmem>>, vector<128x128xf32>,
    } else {
    }
    %c0 = arith.constant 0 : index
    %c0_1 = arith.constant 0 : index
    %3 = vector.load %arg8[%c0, %c0_1] : memref<128x128xf32, #tpu.memory_space<vmem>>, vector<128x128xf32>
    %c0_2 = arith.constant 0 : index
    %c0_3 = arith.constant 0 : index
    %4 = vector.load %arg2[%c0_2, %c0_3] : memref<128x32xf32, #tpu.memory_space<vmem>>, vector<128x32xf32>
    %c0_4 = arith.constant 0 : index
    %c0_5 = arith.constant 0 : index
    %5 = vector.load %arg3[%c0_4, %c0_5] : memref<32x128xf32, #tpu.memory_space<vmem>>, vector<32x128xf32>
    %cst = arith.constant dense<0.000000e+00> : vector<128x128xf32>
    %6 = tpu.matmul %4, %5, %cst {dimension_numbers = #tpu.dot_dimension_numbers<[1], [0], [0], [1], [0, 0, 1, 1], [], []>} : vector<128x32xf32>, vector<32x128xf32>, vector<128x128xf32> -> vector<128x128xf32>
    %7 = arith.addf %3, %6 : vector<128x128xf32>
    %c0_6 = arith.constant 0 : index
    %c0_7 = arith.constant 0 : index
    %8 = vector.load %arg8[%c0_6, %c0_7] : memref<128x128xf32, #tpu.memory_space<vmem>>, vector<128x128xf32>
    tpu.vector_store %arg8[%c0_6, %c0_7], %7 {strides = array<i32>} : memref<128x128xf32, #tpu.memory_space<vmem>>, vector<128x128xf32>,
    %c0_i32_8 = arith.constant 0 : i32
    %9 = arith.cmpi eq, %arg1, %c0_i32_8 : i32
    %10 = arith.extui %9 : i1 to i32
    %c0_i32_9 = arith.constant 0 : i32
    %11 = arith.cmpi ne, %10, %c0_i32_9 : i32
    scf.if %11 {
      %c0_10 = arith.constant 0 : index
      %c0_11 = arith.constant 0 : index
      %12 = vector.load %arg8[%c0_10, %c0_11] : memref<128x128xf32, #tpu.memory_space<vmem>>, vector<128x128xf32>
      %c0_12 = arith.constant 0 : index
      %c0_13 = arith.constant 0 : index
      %13 = vector.load %arg4[%c0_12, %c0_13] : memref<1x128xf32, #tpu.memory_space<vmem>>, vector<1x128xf32>
      %14 = vector.broadcast %13 : vector<1x128xf32> to vector<128x128xf32>
      %15 = arith.addf %12, %14 : vector<128x128xf32>
      %cst_14 = arith.constant dense<0.000000e+00> : vector<128xf32>
      %16 = vector.multi_reduction <add>, %15, %cst_14 [1] : vector<128x128xf32> to vector<128xf32>
      %17 = vector.shape_cast %16 : vector<128xf32> to vector<128x1xf32>
      %cst_15 = arith.constant 1.562500e-02 : f32
      %18 = vector.broadcast %cst_15 : f32 to vector<128x1xf32>
      %19 = arith.mulf %17, %18 : vector<128x1xf32>
      %20 = vector.broadcast %19 : vector<128x1xf32> to vector<128x128xf32>
      %21 = arith.subf %15, %20 : vector<128x128xf32>
      %22 = tpu.iota {dimensions = array<i32: 1>} : vector<1x128xi32>
      %c64_i32 = arith.constant 64 : i32
      %23 = vector.broadcast %c64_i32 : i32 to vector<1x128xi32>
      %24 = arith.cmpi slt, %22, %23 : vector<1x128xi32>
      %cst_16 = arith.constant 0.000000e+00 : f32
      %25 = vector.shape_cast %24 : vector<1x128xi1> to vector<1x128xi1>
      %26 = vector.broadcast %25 : vector<1x128xi1> to vector<128x128xi1>
      %27 = vector.broadcast %cst_16 : f32 to vector<128x128xf32>
      %28 = arith.select %26, %21, %27 : vector<128x128xi1>, vector<128x128xf32>
      %29 = arith.mulf %28, %28 : vector<128x128xf32>
      %cst_17 = arith.constant dense<0.000000e+00> : vector<128xf32>
      %30 = vector.multi_reduction <add>, %29, %cst_17 [1] : vector<128x128xf32> to vector<128xf32>
      %31 = vector.shape_cast %30 : vector<128xf32> to vector<128x1xf32>
      %cst_18 = arith.constant 1.562500e-02 : f32
      %32 = vector.broadcast %cst_18 : f32 to vector<128x1xf32>
      %33 = arith.mulf %31, %32 : vector<128x1xf32>
      %cst_19 = arith.constant 9.99999974E-6 : f32
      %34 = vector.broadcast %cst_19 : f32 to vector<128x1xf32>
      %35 = arith.addf %33, %34 : vector<128x1xf32>
      %36 = math.rsqrt %35 : vector<128x1xf32>
      %37 = vector.broadcast %36 : vector<128x1xf32> to vector<128x128xf32>
      %38 = arith.mulf %28, %37 : vector<128x128xf32>
      %c0_20 = arith.constant 0 : index
      %c0_21 = arith.constant 0 : index
      %39 = vector.load %arg5[%c0_20, %c0_21] : memref<1x128xf32, #tpu.memory_space<vmem>>, vector<1x128xf32>
      %40 = vector.broadcast %39 : vector<1x128xf32> to vector<128x128xf32>
      %41 = arith.mulf %38, %40 : vector<128x128xf32>
      %c0_22 = arith.constant 0 : index
      %c0_23 = arith.constant 0 : index
      %42 = vector.load %arg6[%c0_22, %c0_23] : memref<1x128xf32, #tpu.memory_space<vmem>>, vector<1x128xf32>
      %43 = vector.broadcast %42 : vector<1x128xf32> to vector<128x128xf32>
      %44 = arith.addf %41, %43 : vector<128x128xf32>
      %c0_24 = arith.constant 0 : index
      %c0_25 = arith.constant 0 : index
      %45 = vector.load %arg7[%c0_24, %c0_25] : memref<128x128xf32, #tpu.memory_space<vmem>>, vector<128x128xf32>
      tpu.vector_store %arg7[%c0_24, %c0_25], %44 {strides = array<i32>} : memref<128x128xf32, #tpu.memory_space<vmem>>, vector<128x128xf32>,
    } else {
    }
    return
  }
  func.func @transform_0(%arg0: i32, %arg1: i32) -> (i32, i32) {
    %c0_i32 = arith.constant 0 : i32
    return %arg0, %arg1 : i32, i32
  }
  func.func @transform_1(%arg0: i32, %arg1: i32) -> (i32, i32) {
    %c0_i32 = arith.constant 0 : i32
    %c0_i32_0 = arith.constant 0 : i32
    return %arg1, %c0_i32 : i32, i32
  }
  func.func @transform_2(%arg0: i32, %arg1: i32) -> (i32, i32) {
    %c0_i32 = arith.constant 0 : i32
    %c0_i32_0 = arith.constant 0 : i32
    %c0_i32_1 = arith.constant 0 : i32
    return %c0_i32, %c0_i32_0 : i32, i32
  }
  func.func @transform_3(%arg0: i32, %arg1: i32) -> (i32, i32) {
    %c0_i32 = arith.constant 0 : i32
    %c0_i32_0 = arith.constant 0 : i32
    %c0_i32_1 = arith.constant 0 : i32
    return %c0_i32, %c0_i32_0 : i32, i32
  }
  func.func @transform_4(%arg0: i32, %arg1: i32) -> (i32, i32) {
    %c0_i32 = arith.constant 0 : i32
    %c0_i32_0 = arith.constant 0 : i32
    %c0_i32_1 = arith.constant 0 : i32
    return %c0_i32, %c0_i32_0 : i32, i32
  }
  func.func @transform_5(%arg0: i32, %arg1: i32) -> (i32, i32) {
    %c0_i32 = arith.constant 0 : i32
    %c0_i32_0 = arith.constant 0 : i32
    return %arg0, %c0_i32 : i32, i32
  }
}

</mosaic_0001>

<bundles_post_ra>
// kernel: block_forward.1
= control target key start
LH: loop header
LB: loop body
LE: loop exit
PB: predicated region body
PF: predicated region fallthrough
CT: control target
= control target key end

     0   :  { %vm76_vm0 = vcmask 261120   ;;  %v408_v53 = vlaneseq  ;;  %s1092_s1 = inlined_call_operand.vmem [shape: f32[32,128], index: 1, kind: input, shape index: {}]   ;;  %s1093_s0 = inlined_call_operand.vmem [shape: f32[128,32], index: 0, kind: input, shape index: {}]   ;;  %s1094_s2 = inlined_call_operand.vmem [shape: f32[1,128], index: 2, kind: input, shape index: {}]   ;;  %s1095_s3 = inlined_call_operand.vmem [shape: f32[1,128], index: 3, kind: input, shape index: {}]   ;;  %s1096_s4 = inlined_call_operand.vmem [shape: f32[1,128], index: 4, kind: input, shape index: {}]   ;;  %s1097_s5 = inlined_call_operand.vmem [shape: f32[128,128], index: 5, kind: output, shape index: {}]  }
   0x1   :  { %v75_v0 = vld [vmem:[%s1092_s1 + $0x18] sm:$0xff]  ;;  %v74_v1 = vld [vmem:[%s1092_s1 + $0x10] sm:$0xff]  ;;  %v73_v2 = vld [vmem:[%s1092_s1 + $0x8] sm:$0xff] }
   0x2   :  { %646 = vmatprep.subr.mxu0 %v75_v0  ;;  %678 = vmatprep.subr.mxu1 %v75_v0  ;;  %v72_v3 = vld [vmem:[%s1092_s1] sm:$0xff]  ;;  %v57_v6 = vld [vmem:[%s1093_s0 + $0x8] sm:$0xff]  ;;  %v58_v8 = vld [vmem:[%s1093_s0 + $0x10] sm:$0xff]  ;;  %v872_v54 = vand.u32 127, %v408_v53 }
   0x3   :  { %647 = vmatpush3.msra.mxu0 %v75_v0  ;;  %682 = vmatpush3.msra.mxu1 %v75_v0  ;;  %v56_v4 = vld [vmem:[%s1093_s0] sm:$0xff]  ;;  %v65_v7 = vld [vmem:[%s1093_s0 + $0x48] sm:$0xff]  ;;  %v66_v9 = vld [vmem:[%s1093_s0 + $0x50] sm:$0xff] }
   0x4   :  { %648 = vmatprep.subr.mxu0 %v74_v1  ;;  %679 = vmatprep.subr.mxu1 %v74_v1  ;;  %v64_v5 = vld [vmem:[%s1093_s0 + $0x40] sm:$0xff]  ;;  %v59_v10 = vld [vmem:[%s1093_s0 + $0x18] sm:$0xff]  ;;  %v61_v14 = vld [vmem:[%s1093_s0 + $0x28] sm:$0xff]  ;;  %vm410_vm1 = vcmp.lt.s32.totalorder %v872_v54, 64 }
   0x5   :  { %649 = vmatpush3.msra.mxu0 %v74_v1  ;;  %683 = vmatpush3.msra.mxu1 %v74_v1  ;;  %v67_v11 = vld [vmem:[%s1093_s0 + $0x58] sm:$0xff]  ;;  %v60_v12 = vld [vmem:[%s1093_s0 + $0x20] sm:$0xff]  ;;  %v69_v15 = vld [vmem:[%s1093_s0 + $0x68] sm:$0xff] }
   0x6   :  { %650 = vmatprep.subr.mxu0 %v73_v2  ;;  %680 = vmatprep.subr.mxu1 %v73_v2  ;;  %v68_v13 = vld [vmem:[%s1093_s0 + $0x60] sm:$0xff]  ;;  %v62_v16 = vld [vmem:[%s1093_s0 + $0x30] sm:$0xff]  ;;  %v63_v18 = vld [vmem:[%s1093_s0 + $0x38] sm:$0xff] }
   0x7   :  { %651 = vmatpush3.msra.mxu0 %v73_v2  ;;  %684 = vmatpush3.msra.mxu1 %v73_v2  ;;  %v70_v17 = vld [vmem:[%s1093_s0 + $0x70] sm:$0xff]  ;;  %v71_v19 = vld [vmem:[%s1093_s0 + $0x78] sm:$0xff]  ;;  %v623_v20 = vld [vmem:[%s1094_s2] ss:$0 sm:$0xff] }
   0x8   :  { %652 = vmatprep.subr.mxu0 %v72_v3  ;;  %681 = vmatprep.subr.mxu1 %v72_v3 }
   0x9   :  { %653 = vmatpush3.msra.mxu0 %v72_v3  ;;  %685 = vmatpush3.msra.mxu1 %v72_v3 }
   0xa   :  { %654 = vmatprep.mubr.msk.f32.mxu0 %vm76_vm0, %v56_v4  ;;  %666 = vmatprep.mubr.msk.f32.mxu1 %vm76_vm0, %v64_v5 }
   0xb   :  { %655 = vmatmul.mubr.msk.f32.vlgmr.msra.gmra.mxu0 %vm76_vm0, %v57_v6  ;;  %667 = vmatmul.mubr.msk.f32.vlgmr.msra.gmra.mxu1 %vm76_vm0, %v65_v7 }
   0xc   :  { %657 = vmatprep.mubr.msk.f32.mxu0 %vm76_vm0, %v58_v8  ;;  %669 = vmatprep.mubr.msk.f32.mxu1 %vm76_vm0, %v66_v9 }
   0xf   :  { %658 = vmatmul.mubr.msk.f32.gmra.mxu0 %vm76_vm0, %v59_v10  ;;  %670 = vmatmul.mubr.msk.f32.gmra.mxu1 %vm76_vm0, %v67_v11 }
  0x10   :  { %660 = vmatprep.mubr.msk.f32.mxu0 %vm76_vm0, %v60_v12  ;;  %672 = vmatprep.mubr.msk.f32.mxu1 %vm76_vm0, %v68_v13 }
  0x13   :  { %661 = vmatmul.mubr.msk.f32.gmra.mxu0 %vm76_vm0, %v61_v14  ;;  %673 = vmatmul.mubr.msk.f32.gmra.mxu1 %vm76_vm0, %v69_v15 }
  0x14   :  { %663 = vmatprep.mubr.msk.f32.mxu0 %vm76_vm0, %v62_v16  ;;  %675 = vmatprep.mubr.msk.f32.mxu1 %vm76_vm0, %v70_v17 }
  0x17   :  { %664 = vmatmul.mubr.msk.f32.gmra.mxu0 %vm76_vm0, %v63_v18  ;;  %676 = vmatmul.mubr.msk.f32.gmra.mxu1 %vm76_vm0, %v71_v19 }
  0xcb   :  { %v656_v21 = vpop.f32.mrf.mxu0  ;;  %v668_v22 = vpop.f32.mrf.mxu1 }
  0xcc   :  { %v329_v23 = vadd.f32 %v656_v21, %v623_v20  ;;  %v827_v24 = vadd.f32 %v668_v22, %v623_v20 }
  0xcd   :  { %v191_v25 = vpop.f32.mrf.mxu0  ;;  %v231_v26 = vpop.f32.mrf.mxu1 }
  0xce   :  { %362 = vadd.xlane.f32.xlu1 %v827_v24  ;;  %346 = vadd.xlane.f32.xlu0 %v329_v23  ;;  %v830_v28 = vadd.f32 %v623_v20, %v191_v25  ;;  %v838_v34 = vadd.f32 %v623_v20, %v231_v26 }
  0xcf   :  { %v659_v27 = vpop.f32.mrf.mxu0  ;;  %v671_v31 = vpop.f32.mrf.mxu1 }
  0xd0   :  { %v832_v29 = vadd.f32 %v659_v27, %v623_v20  ;;  %v834_v32 = vadd.f32 %v671_v31, %v623_v20 }
  0xd1   :  { %v201_v30 = vpop.f32.mrf.mxu0  ;;  %v241_v35 = vpop.f32.mrf.mxu1 }
  0xd2   :  { %344 = vadd.xlane.f32.xlu0 %v830_v28  ;;  %350 = vadd.xlane.f32.xlu1 %v832_v29  ;;  %v842_v38 = vadd.f32 %v623_v20, %v201_v30  ;;  %v844_v39 = vadd.f32 %v623_v20, %v241_v35 }
  0xd3   :  { %v662_v33 = vpop.f32.mrf.mxu0  ;;  %v674_v37 = vpop.f32.mrf.mxu1 }
  0xd4   :  { %v846_v40 = vadd.f32 %v662_v33, %v623_v20  ;;  %v852_v44 = vadd.f32 %v674_v37, %v623_v20 }
  0xd5   :  { %v211_v36 = vpop.f32.mrf.mxu0  ;;  %v251_v42 = vpop.f32.mrf.mxu1 }
  0xd6   :  { %360 = vadd.xlane.f32.xlu0 %v838_v34  ;;  %366 = vadd.xlane.f32.xlu1 %v834_v32  ;;  %v850_v41 = vadd.f32 %v623_v20, %v211_v36  ;;  %v856_v45 = vadd.f32 %v623_v20, %v251_v42 }
  0xd7   :  { %v665_v43 = vpop.f32.mrf.mxu0  ;;  %v677_v47 = vpop.f32.mrf.mxu1 }
  0xd8   :  { %v858_v48 = vadd.f32 %v665_v43, %v623_v20  ;;  %v864_v51 = vadd.f32 %v677_v47, %v623_v20 }
  0xd9   :  { %v221_v46 = vpop.f32.mrf.mxu0  ;;  %v261_v50 = vpop.f32.mrf.mxu1 }
  0xda   :  { %364 = vadd.xlane.f32.xlu0 %v844_v39  ;;  %348 = vadd.xlane.f32.xlu1 %v842_v38  ;;  %v862_v49 = vadd.f32 %v623_v20, %v221_v46  ;;  %v868_v52 = vadd.f32 %v623_v20, %v261_v50 }
  0xde   :  { %354 = vadd.xlane.f32.xlu1 %v846_v40  ;;  %352 = vadd.xlane.f32.xlu0 %v850_v41 }
  0xe2   :  { %370 = vadd.xlane.f32.xlu1 %v852_v44  ;;  %368 = vadd.xlane.f32.xlu0 %v856_v45 }
  0xe6   :  { %358 = vadd.xlane.f32.xlu1 %v858_v48  ;;  %356 = vadd.xlane.f32.xlu0 %v862_v49 }
  0xea   :  { %374 = vadd.xlane.f32.xlu1 %v864_v51  ;;  %372 = vadd.xlane.f32.xlu0 %v868_v52 }
 0x157   :  { %v363_v55 = vpop.xlane.xlu1 %362  ;;  %v347_v56 = vpop.xlane.xlu0 %346 }
 0x158   :  { %v385_v57 = vmul.f32 0.015625, %v363_v55  ;;  %v377_v58 = vmul.f32 0.015625, %v347_v56 }
 0x15a   :  { %v401_v59 = vsub.f32 %v827_v24, %v385_v57  ;;  %v393_v60 = vsub.f32 %v329_v23, %v377_v58 }
 0x15b   :  { %v345_v61 = vpop.xlane.xlu0 %344  ;;  %v351_v62 = vpop.xlane.xlu1 %350 }
 0x15c   :  { %v376_v63 = vmul.f32 0.015625, %v345_v61  ;;  %v379_v0 = vmul.f32 0.015625, %v351_v62  ;;  %v878_v1 = vsel %vm410_vm1, %v393_v60, 0.0  ;;  %v886_v5 = vsel %vm410_vm1, %v401_v59, 0.0 }
 0x15d   :  { %v430_v2 = vmul.f32 %v878_v1, %v878_v1  ;;  %v438_v11 = vmul.f32 %v886_v5, %v886_v5 }
 0x15e   :  { %v392_v3 = vsub.f32 %v830_v28, %v376_v63  ;;  %v395_v4 = vsub.f32 %v832_v29, %v379_v0 }
 0x15f   :  { %v361_v6 = vpop.xlane.xlu0 %360  ;;  %v367_v7 = vpop.xlane.xlu1 %366  ;;  %447 = vadd.xlane.f32.xlu1 %v430_v2 }
 0x160   :  { %v384_v8 = vmul.f32 0.015625, %v361_v6  ;;  %v387_v9 = vmul.f32 0.015625, %v367_v7  ;;  %v890_v10 = vsel %vm410_vm1, %v392_v3, 0.0  ;;  %v900_v15 = vsel %vm410_vm1, %v395_v4, 0.0 }
 0x161   :  { %v429_v12 = vmul.f32 %v890_v10, %v890_v10  ;;  %v432_v21 = vmul.f32 %v900_v15, %v900_v15 }
 0x162   :  { %v400_v13 = vsub.f32 %v838_v34, %v384_v8  ;;  %v403_v14 = vsub.f32 %v834_v32, %v387_v9 }
 0x163   :  { %v365_v16 = vpop.xlane.xlu0 %364  ;;  %v349_v17 = vpop.xlane.xlu1 %348  ;;  %463 = vadd.xlane.f32.xlu1 %v438_v11  ;;  %445 = vadd.xlane.f32.xlu0 %v429_v12 }
 0x164   :  { %v386_v18 = vmul.f32 0.015625, %v365_v16  ;;  %v378_v19 = vmul.f32 0.015625, %v349_v17  ;;  %v904_v20 = vsel %vm410_vm1, %v400_v13, 0.0  ;;  %v914_v25 = vsel %vm410_vm1, %v403_v14, 0.0 }
 0x165   :  { %v437_v22 = vmul.f32 %v904_v20, %v904_v20  ;;  %v440_v31 = vmul.f32 %v914_v25, %v914_v25 }
 0x166   :  { %v402_v23 = vsub.f32 %v844_v39, %v386_v18  ;;  %v394_v24 = vsub.f32 %v842_v38, %v378_v19 }
 0x167   :  { %v355_v26 = vpop.xlane.xlu1 %354  ;;  %v353_v27 = vpop.xlane.xlu0 %352  ;;  %451 = vadd.xlane.f32.xlu1 %v432_v21  ;;  %461 = vadd.xlane.f32.xlu0 %v437_v22 }
 0x168   :  { %v381_v28 = vmul.f32 0.015625, %v355_v26  ;;  %v380_v29 = vmul.f32 0.015625, %v353_v27  ;;  %v918_v30 = vsel %vm410_vm1, %v394_v24, 0.0  ;;  %v928_v35 = vsel %vm410_vm1, %v402_v23, 0.0 }
 0x169   :  { %v431_v32 = vmul.f32 %v918_v30, %v918_v30 }
 0x16a   :  { %v397_v33 = vsub.f32 %v846_v40, %v381_v28  ;;  %v396_v34 = vsub.f32 %v850_v41, %v380_v29  ;;  %v439_v40 = vmul.f32 %v928_v35, %v928_v35 }
 0x16b   :  { %v371_v36 = vpop.xlane.xlu1 %370  ;;  %v369_v37 = vpop.xlane.xlu0 %368  ;;  %467 = vadd.xlane.f32.xlu1 %v440_v31  ;;  %449 = vadd.xlane.f32.xlu0 %v431_v32 }
 0x16c   :  { %v389_v38 = vmul.f32 0.015625, %v371_v36  ;;  %v388_v39 = vmul.f32 0.015625, %v369_v37  ;;  %v932_v42 = vsel %vm410_vm1, %v397_v33, 0.0  ;;  %v942_v47 = vsel %vm410_vm1, %v396_v34, 0.0 }
 0x16d   :  { %v434_v43 = vmul.f32 %v932_v42, %v932_v42 }
 0x16e   :  { %v405_v41 = vsub.f32 %v852_v44, %v389_v38  ;;  %v404_v46 = vsub.f32 %v856_v45, %v388_v39  ;;  %v433_v44 = vmul.f32 %v942_v47, %v942_v47 }
 0x16f   :  { %455 = vadd.xlane.f32.xlu1 %v434_v43  ;;  %v359_v50 = vpop.xlane.xlu1 %358  ;;  %465 = vadd.xlane.f32.xlu0 %v439_v40  ;;  %v357_v53 = vpop.xlane.xlu0 %356  ;;  %v989_v40 = vld [vmem:[%s1095_s3] ss:$0 sm:$0xff] }
 0x170   :  { %v383_v55 = vmul.f32 0.015625, %v359_v50  ;;  %v382_v56 = vmul.f32 0.015625, %v357_v53  ;;  %v946_v57 = vsel %vm410_vm1, %v405_v41, 0.0  ;;  %v956_v60 = vsel %vm410_vm1, %v404_v46, 0.0  ;;  %v995_v53 = vld [vmem:[%s1096_s4] ss:$0 sm:$0xff] }
 0x171   :  { %v442_v58 = vmul.f32 %v946_v57, %v946_v57 }
 0x172   :  { %v399_v45 = vsub.f32 %v858_v48, %v383_v55  ;;  %v398_v59 = vsub.f32 %v862_v49, %v382_v56  ;;  %v441_v48 = vmul.f32 %v956_v60, %v956_v60 }
 0x173   :  { %471 = vadd.xlane.f32.xlu1 %v442_v58  ;;  %v375_v61 = vpop.xlane.xlu1 %374  ;;  %453 = vadd.xlane.f32.xlu0 %v433_v44  ;;  %v373_v62 = vpop.xlane.xlu0 %372 }
 0x174   :  { %v391_v63 = vmul.f32 0.015625, %v375_v61  ;;  %v390_v0 = vmul.f32 0.015625, %v373_v62  ;;  %v960_v2 = vsel %vm410_vm1, %v399_v45, 0.0  ;;  %v970_v6 = vsel %vm410_vm1, %v398_v59, 0.0 }
 0x175   :  { %v436_v3 = vmul.f32 %v960_v2, %v960_v2  ;;  %v435_v9 = vmul.f32 %v970_v6, %v970_v6 }
 0x176   :  { %v407_v49 = vsub.f32 %v864_v51, %v391_v63  ;;  %v406_v4 = vsub.f32 %v868_v52, %v390_v0 }
 0x177   :  { %459 = vadd.xlane.f32.xlu1 %v436_v3  ;;  %469 = vadd.xlane.f32.xlu0 %v441_v48 }
 0x178   :  { %v974_v7 = vsel %vm410_vm1, %v407_v49, 0.0  ;;  %v982_v51 = vsel %vm410_vm1, %v406_v4, 0.0 }
 0x179   :  { %v444_v8 = vmul.f32 %v974_v7, %v974_v7  ;;  %v443_v52 = vmul.f32 %v982_v51, %v982_v51 }
 0x17b   :  { %475 = vadd.xlane.f32.xlu1 %v444_v8  ;;  %457 = vadd.xlane.f32.xlu0 %v435_v9 }
 0x17f   :  { %473 = vadd.xlane.f32.xlu0 %v443_v52 }
 0x1e8   :  { %v448_v11 = vpop.xlane.xlu1 %447 }
 0x1e9   :  { %v478_v12 = vmul.f32 0.015625, %v448_v11 }
 0x1eb   :  { %v494_v13 = vadd.f32 1e-05, %v478_v12 }
 0x1ec   :  { %v464_v14 = vpop.xlane.xlu1 %463  ;;  %v446_v16 = vpop.xlane.xlu0 %445 }
 0x1ed   :  { %686 = vrsqrt.f32 %v494_v13  ;;  %v486_v17 = vmul.f32 0.015625, %v464_v14  ;;  %v477_v18 = vmul.f32 0.015625, %v446_v16 }
 0x1ef   :  { %v502_v19 = vadd.f32 1e-05, %v486_v17  ;;  %v493_v21 = vadd.f32 1e-05, %v477_v18 }
 0x1f0   :  { %v452_v22 = vpop.xlane.xlu1 %451  ;;  %v462_v54 = vpop.xlane.xlu0 %461 }
 0x1f1   :  { %688 = vrsqrt.f32 %v502_v19  ;;  %v480_v23 = vmul.f32 0.015625, %v452_v22  ;;  %v485_v24 = vmul.f32 0.015625, %v462_v54 }
 0x1f2   :  { %690 = vrsqrt.f32 %v493_v21 }
 0x1f3   :  { %v496_v26 = vadd.f32 1e-05, %v480_v23  ;;  %v501_v27 = vadd.f32 1e-05, %v485_v24 }
 0x1f4   :  { %v468_v28 = vpop.xlane.xlu1 %467  ;;  %v450_v29 = vpop.xlane.xlu0 %449 }
 0x1f5   :  { %692 = vrsqrt.f32 %v496_v26  ;;  %v488_v31 = vmul.f32 0.015625, %v468_v28  ;;  %v479_v32 = vmul.f32 0.015625, %v450_v29 }
 0x1f6   :  { %694 = vrsqrt.f32 %v501_v27 }
 0x1f7   :  { %v504_v33 = vadd.f32 1e-05, %v488_v31  ;;  %v495_v34 = vadd.f32 1e-05, %v479_v32 }
 0x1f8   :  { %v456_v36 = vpop.xlane.xlu1 %455  ;;  %v466_v37 = vpop.xlane.xlu0 %465 }
 0x1f9   :  { %696 = vrsqrt.f32 %v504_v33  ;;  %v482_v38 = vmul.f32 0.015625, %v456_v36  ;;  %v487_v39 = vmul.f32 0.015625, %v466_v37 }
 0x1fa   :  { %v687_v43 = vpop.eup %686  ;;  %698 = vrsqrt.f32 %v495_v34 }
 0x1fb   :  { %v526_v41 = vmul.f32 %v687_v43, %v878_v1  ;;  %v498_v46 = vadd.f32 1e-05, %v482_v38  ;;  %v503_v50 = vadd.f32 1e-05, %v487_v39 }
 0x1fc   :  { %v472_v55 = vpop.xlane.xlu1 %471  ;;  %v454_v56 = vpop.xlane.xlu0 %453 }
 0x1fd   :  { %v549_v58 = vmul.f32 %v989_v40, %v526_v41  ;;  %700 = vrsqrt.f32 %v498_v46  ;;  %v490_v44 = vmul.f32 0.015625, %v472_v55  ;;  %v481_v45 = vmul.f32 0.015625, %v454_v56 }
 0x1fe   :  { %v689_v59 = vpop.eup %688  ;;  %702 = vrsqrt.f32 %v503_v50 }
 0x1ff   :  { %v691_v61 = vpop.eup %690  ;;  %v572_v62 = vadd.f32 %v995_v53, %v549_v58  ;;  %v534_v1 = vmul.f32 %v689_v59, %v886_v5  ;;  %v506_v63 = vadd.f32 1e-05, %v490_v44  ;;  %v497_v0 = vadd.f32 1e-05, %v481_v45 }
 0x200   :  { %v525_v3 = vmul.f32 %v691_v61, %v890_v10  ;;  %v460_v48 = vpop.xlane.xlu1 %459  ;;  %v470_v49 = vpop.xlane.xlu0 %469 }
 0x201   :  { %588 = vst [vmem:[%s1097_s5 + $0x8] sm:$0xff] %v572_v62  ;;  %v557_v4 = vmul.f32 %v989_v40, %v534_v1  ;;  %704 = vrsqrt.f32 %v506_v63  ;;  %v484_v8 = vmul.f32 0.015625, %v460_v48  ;;  %v489_v9 = vmul.f32 0.015625, %v470_v49 }
 0x202   :  { %v693_v52 = vpop.eup %692  ;;  %v548_v11 = vmul.f32 %v989_v40, %v525_v3  ;;  %706 = vrsqrt.f32 %v497_v0 }
 0x203   :  { %v695_v5 = vpop.eup %694  ;;  %v580_v12 = vadd.f32 %v995_v53, %v557_v4  ;;  %v528_v10 = vmul.f32 %v693_v52, %v900_v15  ;;  %v500_v13 = vadd.f32 1e-05, %v484_v8  ;;  %v505_v14 = vadd.f32 1e-05, %v489_v9 }
 0x204   :  { %v571_v16 = vadd.f32 %v995_v53, %v548_v11  ;;  %v533_v17 = vmul.f32 %v695_v5, %v904_v20  ;;  %v476_v18 = vpop.xlane.xlu1 %475  ;;  %v458_v19 = vpop.xlane.xlu0 %457 }
 0x205   :  { %596 = vst [vmem:[%s1097_s5 + $0x48] sm:$0xff] %v580_v12  ;;  %v551_v21 = vmul.f32 %v989_v40, %v528_v10  ;;  %708 = vrsqrt.f32 %v500_v13  ;;  %v492_v22 = vmul.f32 0.015625, %v476_v18  ;;  %v483_v54 = vmul.f32 0.015625, %v458_v19 }
 0x206   :  { %v697_v23 = vpop.eup %696  ;;  %587 = vst [vmem:[%s1097_s5] sm:$0xff] %v571_v16  ;;  %v556_v15 = vmul.f32 %v989_v40, %v533_v17  ;;  %710 = vrsqrt.f32 %v505_v14 }
 0x207   :  { %v699_v20 = vpop.eup %698  ;;  %v574_v24 = vadd.f32 %v995_v53, %v551_v21  ;;  %v536_v26 = vmul.f32 %v697_v23, %v914_v25  ;;  %v508_v27 = vadd.f32 1e-05, %v492_v22  ;;  %v499_v28 = vadd.f32 1e-05, %v483_v54 }
 0x208   :  { %v579_v29 = vadd.f32 %v995_v53, %v556_v15  ;;  %v527_v31 = vmul.f32 %v699_v20, %v918_v30  ;;  %v474_v32 = vpop.xlane.xlu0 %473 }
 0x209   :  { %590 = vst [vmem:[%s1097_s5 + $0x18] sm:$0xff] %v574_v24  ;;  %v559_v33 = vmul.f32 %v989_v40, %v536_v26  ;;  %712 = vrsqrt.f32 %v508_v27  ;;  %v491_v34 = vmul.f32 0.015625, %v474_v32 }
 0x20a   :  { %v701_v36 = vpop.eup %700  ;;  %595 = vst [vmem:[%s1097_s5 + $0x40] sm:$0xff] %v579_v29  ;;  %v550_v25 = vmul.f32 %v989_v40, %v527_v31  ;;  %714 = vrsqrt.f32 %v499_v28 }
 0x20b   :  { %v703_v37 = vpop.eup %702  ;;  %v582_v30 = vadd.f32 %v995_v53, %v559_v33  ;;  %v530_v38 = vmul.f32 %v701_v36, %v932_v42  ;;  %v507_v39 = vadd.f32 1e-05, %v491_v34 }
 0x20c   :  { %v573_v43 = vadd.f32 %v995_v53, %v550_v25  ;;  %v535_v41 = vmul.f32 %v703_v37, %v928_v35 }
 0x20d   :  { %598 = vst [vmem:[%s1097_s5 + $0x58] sm:$0xff] %v582_v30  ;;  %v553_v46 = vmul.f32 %v989_v40, %v530_v38  ;;  %716 = vrsqrt.f32 %v507_v39 }
 0x20e   :  { %v705_v50 = vpop.eup %704  ;;  %589 = vst [vmem:[%s1097_s5 + $0x10] sm:$0xff] %v573_v43  ;;  %v558_v55 = vmul.f32 %v989_v40, %v535_v41 }
 0x20f   :  { %v707_v42 = vpop.eup %706  ;;  %v576_v56 = vadd.f32 %v995_v53, %v553_v46  ;;  %v538_v58 = vmul.f32 %v705_v50, %v946_v57 }
 0x210   :  { %v581_v35 = vadd.f32 %v995_v53, %v558_v55  ;;  %v529_v44 = vmul.f32 %v707_v42, %v942_v47 }
 0x211   :  { %592 = vst [vmem:[%s1097_s5 + $0x28] sm:$0xff] %v576_v56  ;;  %v561_v45 = vmul.f32 %v989_v40, %v538_v58 }
 0x212   :  { %v709_v59 = vpop.eup %708  ;;  %597 = vst [vmem:[%s1097_s5 + $0x50] sm:$0xff] %v581_v35  ;;  %v552_v61 = vmul.f32 %v989_v40, %v529_v44 }
 0x213   :  { %v711_v62 = vpop.eup %710  ;;  %v584_v57 = vadd.f32 %v995_v53, %v561_v45  ;;  %v532_v1 = vmul.f32 %v709_v59, %v960_v2 }
 0x214   :  { %v575_v47 = vadd.f32 %v995_v53, %v552_v61  ;;  %v537_v63 = vmul.f32 %v711_v62, %v956_v60 }
 0x215   :  { %600 = vst [vmem:[%s1097_s5 + $0x68] sm:$0xff] %v584_v57  ;;  %v555_v0 = vmul.f32 %v989_v40, %v532_v1 }
 0x216   :  { %v713_v3 = vpop.eup %712  ;;  %591 = vst [vmem:[%s1097_s5 + $0x20] sm:$0xff] %v575_v47  ;;  %v560_v48 = vmul.f32 %v989_v40, %v537_v63 }
 0x217   :  { %v715_v49 = vpop.eup %714  ;;  %v578_v2 = vadd.f32 %v995_v53, %v555_v0  ;;  %v540_v4 = vmul.f32 %v713_v3, %v974_v7 }
 0x218   :  { %v583_v60 = vadd.f32 %v995_v53, %v560_v48  ;;  %v531_v8 = vmul.f32 %v715_v49, %v970_v6 }
 0x219   :  { %594 = vst [vmem:[%s1097_s5 + $0x38] sm:$0xff] %v578_v2  ;;  %v563_v9 = vmul.f32 %v989_v40, %v540_v4 }
 0x21a   :  { %v717_v52 = vpop.eup %716  ;;  %599 = vst [vmem:[%s1097_s5 + $0x60] sm:$0xff] %v583_v60  ;;  %v554_v11 = vmul.f32 %v989_v40, %v531_v8 }
 0x21b   :  { %v586_v5 = vadd.f32 %v995_v53, %v563_v9  ;;  %v539_v7 = vmul.f32 %v717_v52, %v982_v51 }
 0x21c   :  { %v577_v12 = vadd.f32 %v995_v53, %v554_v11 }
 0x21d   :  { %602 = vst [vmem:[%s1097_s5 + $0x78] sm:$0xff] %v586_v5  ;;  %v562_v6 = vmul.f32 %v989_v40, %v539_v7 }
 0x21e   :  { %593 = vst [vmem:[%s1097_s5 + $0x30] sm:$0xff] %v577_v12 }
 0x21f   :  { %v585_v10 = vadd.f32 %v995_v53, %v562_v6 }
 0x221   :  { %601 = vst [vmem:[%s1097_s5 + $0x70] sm:$0xff] %v585_v10 }

</bundles_post_ra>
